<compile_context>
chip_gen: v5e
topology: v5e:2x2
jax: 0.10.0
libtpu: 0.0.40
codegen_flags: <defaults>
</compile_context>

<pallas_src>
import functools
import math

import jax
import jax.numpy as jnp
from jax.experimental import pallas as pl
from jax.experimental.pallas import tpu as pltpu

NUM_HEADS = 4  # matches nn.MultiheadAttention(embed_dim=output_feat*7, num_heads=4)


# --------------------------------------------------------------- kernels ----
def gnn_kernel_mean(x_ref, wg_ref, bg_ref, o_ref):
    # indicator == 0: adj2 = ones(8,8)/8 is rank-1 -> per-element node mean.
    x3 = x_ref[...]                                   # (TB, C, D)
    TB, C, D = x3.shape
    mean = jnp.mean(x3, axis=1)                       # (TB, D) sublane reduce
    proj = jnp.dot(mean, wg_ref[...],
                   preferred_element_type=jnp.float32) + bg_ref[...]
    o_ref[...] = jnp.broadcast_to(proj[:, None, :], (TB, C, D)).astype(o_ref.dtype)


def gnn_kernel_cat(x_ref, wcs_ref, wcn_ref, bc_ref, o_ref):
    # indicator == 1: neighbor = ones - I -> row-sum minus self; lane-aligned
    # split weights replace the (C, 2D) concatenation.
    x3 = x_ref[...]                                   # (TB, C, D)
    TB, C, D = x3.shape
    nx = jnp.sum(x3, axis=1, keepdims=True) - x3      # (TB, C, D)
    x2d = x3.reshape(TB * C, D)
    nx2d = nx.reshape(TB * C, D)
    out = (jnp.dot(x2d, wcs_ref[...], preferred_element_type=jnp.float32)
           + jnp.dot(nx2d, wcn_ref[...], preferred_element_type=jnp.float32)
           + bc_ref[...])
    o_ref[...] = out.reshape(TB, C, D).astype(o_ref.dtype)


def gnn_kernel_attn(x_ref, wqk_ref, bqk_ref, o_ref):
    # indicator == 2: averaged MHA attention weights applied to x.
    x3 = x_ref[...]                                   # (TB, C, D)
    TB, C, D = x3.shape
    N = TB * C
    x2d = x3.reshape(N, D)
    hd = D // NUM_HEADS
    scale = 1.0 / math.sqrt(hd)

    # Fused lane-packed Q|K projection: wq in lanes [0, D), wk in [pad, pad+D).
    r = jnp.dot(x2d, wqk_ref[...], preferred_element_type=jnp.float32) + bqk_ref[...]
    pad = r.shape[1] // 2
    q = r[:, :D]                                      # vreg 0 lanes
    k = r[:, pad:pad + D]                             # 128-aligned slice

    # Block-diagonal additive mask: each batch element attends only within its
    # own C-node block of the (TB*C, TB*C) score matrix.
    row_blk = jax.lax.broadcasted_iota(jnp.int32, (N, N), 0) // C
    col_blk = jax.lax.broadcasted_iota(jnp.int32, (N, N), 1) // C
    neg_mask = jnp.where(row_blk == col_blk, 0.0, -1e30).astype(jnp.float32)

    lane = jax.lax.broadcasted_iota(jnp.int32, (1, D), 1)
    attn_sum = jnp.zeros((N, N), jnp.float32)
    for h in range(NUM_HEADS):                        # static, fully unrolled
        # Head selection via a lane mask (softmax scale folded in): avoids
        # non-aligned lane slices; MXU cost identical since K pads to 128.
        head_mask = jnp.where((lane >= h * hd) & (lane < (h + 1) * hd),
                              jnp.float32(scale), jnp.float32(0.0))
        s = jax.lax.dot_general(q * head_mask, k,
                                (((1,), (1,)), ((), ())),
                                preferred_element_type=jnp.float32) + neg_mask
        s = s - jnp.max(s, axis=-1, keepdims=True)
        e = jnp.exp(s)
        attn_sum = attn_sum + e * pl.reciprocal(
            jnp.sum(e, axis=-1, keepdims=True), approx=True)
    attn_avg = attn_sum * (1.0 / NUM_HEADS)           # == `b` from nn.MHA

    out = jnp.dot(attn_avg, x2d, preferred_element_type=jnp.float32)
    o_ref[...] = out.reshape(TB, C, D).astype(o_ref.dtype)


# --------------------------------------------------------------- wrapper ----
def _choose_tb(batch, nodes, target_rows=256):
    """Largest batch block with tb*nodes ~ target_rows that divides `batch`,
    keeping >= 2 grid steps when possible so v7x can shard across both TCs."""
    tb = max(1, min(batch, max(1, target_rows // nodes)))
    if batch >= 2:
        tb = max(1, min(tb, batch // 2))
    while batch % tb:
        tb -= 1
    return tb


@functools.partial(jax.jit, static_argnames=("indicator",))
def gnn_forward(x, params, indicator):
    B, T, C, F = x.shape
    D = T * F
    x2 = jnp.transpose(x, (0, 2, 1, 3)).reshape(B, C, D).astype(jnp.float32)

    TB = _choose_tb(B, C)
    grid = (B // TB,)

    def rep_spec(shape):
        return pl.BlockSpec(shape, lambda b: (0,) * len(shape))

    x_spec = pl.BlockSpec((TB, C, D), lambda b: (b, 0, 0))
    o_spec = pl.BlockSpec((TB, C, D), lambda b: (b, 0, 0))

    # Only the operands actually used by this indicator are passed (and DMA'd).
    if indicator == 0:
        kernel = gnn_kernel_mean
        operands = (params["wg"], params["bg"])
        w_specs = [rep_spec((D, D)), rep_spec((1, D))]
    elif indicator == 1:
        kernel = gnn_kernel_cat
        operands = (params["wc"][:D], params["wc"][D:], params["bc"])
        w_specs = [rep_spec((D, D)), rep_spec((D, D)), rep_spec((1, D))]
    else:
        kernel = gnn_kernel_attn
        pad = ((D + 127) // 128) * 128                # lane-align the K half
        wqk = jnp.zeros((D, 2 * pad), jnp.float32)
        wqk = wqk.at[:, :D].set(params["wq"]).at[:, pad:pad + D].set(params["wk"])
        bqk = jnp.zeros((1, 2 * pad), jnp.float32)
        bqk = bqk.at[:, :D].set(params["bq"]).at[:, pad:pad + D].set(params["bk"])
        operands = (wqk, bqk)
        w_specs = [rep_spec((D, 2 * pad)), rep_spec((1, 2 * pad))]

    out = pl.pallas_call(
        kernel,
        out_shape=jax.ShapeDtypeStruct((B, C, D), jnp.float32),
        grid_spec=pltpu.PrefetchScalarGridSpec(
            num_scalar_prefetch=0,
            grid=grid,
            in_specs=[x_spec] + w_specs,
            out_specs=o_spec,
        ),
        compiler_params=pltpu.CompilerParams(dimension_semantics=("parallel",)),
    )(x2, *operands)

    # exact PyTorch epilogue: x.reshape(C, T, B, -1); transpose(0, 2)
    out = out.reshape(C, T, B, -1)
    return jnp.transpose(out, (2, 1, 0, 3))


# ------------------------------------------------------------- reference ----
def gnn_reference(x, params, indicator):
    """Pure-JAX mirror of the PyTorch forward (for validation)."""
    B, T, C, F = x.shape
    D = T * F
    xx = jnp.transpose(x, (0, 2, 1, 3)).reshape(B, C, D).astype(jnp.float32)
    hd = D // NUM_HEADS
    q = xx @ params["wq"] + params["bq"]
    k = xx @ params["wk"] + params["bk"]
    qh = q.reshape(B, C, NUM_HEADS, hd)
    kh = k.reshape(B, C, NUM_HEADS, hd)
    scores = jnp.einsum("bqhd,bkhd->bhqk", qh, kh) / math.sqrt(hd)
    b_attn = jax.nn.softmax(scores, axis=-1).mean(axis=1)
    if indicator == 0:
        adj2 = jnp.full((C, C), 1.0 / C, jnp.float32)
        h0 = jnp.einsum("ij,bjd->bid", adj2, xx)
        out = h0 @ params["wg"] + params["bg"]
    elif indicator == 1:
        neighbor = jnp.ones((C, C), jnp.float32) - jnp.eye(C, dtype=jnp.float32)
        nx = jnp.einsum("ij,bjd->bid", neighbor, xx)
        out = jnp.concatenate([xx, nx], axis=2) @ params["wc"] + params["bc"]
    else:
        out = jnp.einsum("bij,bjd->bid", b_attn, xx)
    out = out.reshape(C, T, B, -1)
    return jnp.transpose(out, (2, 1, 0, 3))


# ----------------------------------------------------------------- params ---
def xavier_uniform(key, shape):
    fan_in, fan_out = shape
    a = math.sqrt(6.0 / (fan_in + fan_out))
    return jax.random.uniform(key, shape, jnp.float32, -a, a)


def make_params(key, D):
    ks = jax.random.split(key, 8)
    return {
        "wq": xavier_uniform(ks[0], (D, D)),
        "wk": xavier_uniform(ks[1], (D, D)),
        "bq": 0.1 * jax.random.normal(ks[2], (1, D), jnp.float32),
        "bk": 0.1 * jax.random.normal(ks[3], (1, D), jnp.float32),
        "wg": xavier_uniform(ks[4], (D, D)),                  # W_gnn
        "bg": jax.random.normal(ks[5], (1, D), jnp.float32),  # B_gnn
        "wc": xavier_uniform(ks[6], (2 * D, D)),              # W_cat
        "bc": jax.random.normal(ks[7], (1, D), jnp.float32),  # B_cat
    }


if __name__ == "__main__":
    # Shapes consistent with the module: C must be 8 (adjacency is 8x8),
    # T*F == input_feat*7 == output_feat*7 (input_feat=output_feat=4 => D=28,
    # divisible by num_heads=4), and T must divide D for the final reshape.
    key = jax.random.PRNGKey(0)
    kx, kp = jax.random.split(key)

    B, T, C, F = 8, 4, 8, 7
    D = T * F  # 28
    x = jax.random.normal(kx, (B, T, C, F), jnp.float32)
    params = make_params(kp, D)

    ok = True
    for indicator in (0, 1, 2):
        out = jax.block_until_ready(gnn_forward(x, params, indicator=indicator))
        ref = jax.block_until_ready(gnn_reference(x, params, indicator))
        assert out.shape == (B, T, C, D // T), out.shape
        if not jnp.allclose(out, ref, rtol=2e-2, atol=2e-2):
            ok = False
            print(f"mismatch for indicator={indicator}: "
                  f"max abs err {float(jnp.max(jnp.abs(out - ref)))}")

    # Also exercise the small-batch (TB=1) path.
    x_small = jax.random.normal(jax.random.PRNGKey(1), (2, T, C, F), jnp.float32)
    out_s = jax.block_until_ready(gnn_forward(x_small, params, indicator=2))
    ref_s = gnn_reference(x_small, params, 2)
    if not jnp.allclose(out_s, ref_s, rtol=2e-2, atol=2e-2):
        ok = False
        print("mismatch for small-batch indicator=2: "
              f"max abs err {float(jnp.max(jnp.abs(out_s - ref_s)))}")

    if ok:
        print("KERNEL_OK")
</pallas_src>

<mosaic_0001>
module attributes {stable_mosaic.version = 11 : i64} {
  func.func @gnn_kernel_mean(%arg0: i32, %arg1: memref<4x8x28xf32, #tpu.memory_space<vmem>>, %arg2: memref<28x28xf32, #tpu.memory_space<vmem>>, %arg3: memref<1x28xf32, #tpu.memory_space<vmem>>, %arg4: memref<4x8x28xf32, #tpu.memory_space<vmem>>) attributes {dimension_semantics = [#tpu.dimension_semantics<parallel>], iteration_bounds = array<i64: 2>, scalar_prefetch = 0 : i64, scratch_operands = 0 : i64, tpu.core_type = #tpu.core_type<tc>, window_params = [{transform_indices = @transform_0, window_bounds = array<i64: 4, 8, 28>}, {pipeline_mode = #tpu.pipeline_mode<synchronous>, transform_indices = @transform_1, window_bounds = array<i64: 28, 28>}, {pipeline_mode = #tpu.pipeline_mode<synchronous>, transform_indices = @transform_2, window_bounds = array<i64: 1, 28>}, {transform_indices = @transform_3, window_bounds = array<i64: 4, 8, 28>}]} {
    %c0 = arith.constant 0 : index
    %c0_0 = arith.constant 0 : index
    %c0_1 = arith.constant 0 : index
    %0 = vector.load %arg1[%c0, %c0_0, %c0_1] : memref<4x8x28xf32, #tpu.memory_space<vmem>>, vector<4x8x28xf32>
    %cst = arith.constant dense<0.000000e+00> : vector<4x28xf32>
    %1 = vector.multi_reduction <add>, %0, %cst [1] : vector<4x8x28xf32> to vector<4x28xf32>
    %cst_2 = arith.constant 8.000000e+00 : f32
    %2 = vector.broadcast %cst_2 : f32 to vector<4x28xf32>
    %3 = arith.divf %1, %2 : vector<4x28xf32>
    %c0_3 = arith.constant 0 : index
    %c0_4 = arith.constant 0 : index
    %4 = vector.load %arg2[%c0_3, %c0_4] : memref<28x28xf32, #tpu.memory_space<vmem>>, vector<28x28xf32>
    %cst_5 = arith.constant dense<0.000000e+00> : vector<4x28xf32>
    %5 = tpu.matmul %3, %4, %cst_5 {dimension_numbers = #tpu.dot_dimension_numbers<[1], [0], [0], [1], [0, 0, 1, 1], [], []>} : vector<4x28xf32>, vector<28x28xf32>, vector<4x28xf32> -> vector<4x28xf32>
    %c0_6 = arith.constant 0 : index
    %c0_7 = arith.constant 0 : index
    %6 = vector.load %arg3[%c0_6, %c0_7] : memref<1x28xf32, #tpu.memory_space<vmem>>, vector<1x28xf32>
    %7 = vector.broadcast %6 : vector<1x28xf32> to vector<4x28xf32>
    %8 = arith.addf %5, %7 : vector<4x28xf32>
    %9 = vector.shape_cast %8 : vector<4x28xf32> to vector<4x1x28xf32>
    %10 = vector.shape_cast %9 : vector<4x1x28xf32> to vector<4x1x28xf32>
    %11 = vector.broadcast %10 : vector<4x1x28xf32> to vector<4x8x28xf32>
    %c0_8 = arith.constant 0 : index
    %c0_9 = arith.constant 0 : index
    %c0_10 = arith.constant 0 : index
    %12 = vector.load %arg4[%c0_8, %c0_9, %c0_10] : memref<4x8x28xf32, #tpu.memory_space<vmem>>, vector<4x8x28xf32>
    tpu.vector_store %arg4[%c0_8, %c0_9, %c0_10], %11 {strides = array<i32>} : memref<4x8x28xf32, #tpu.memory_space<vmem>>, vector<4x8x28xf32>,
    return
  }
  func.func @transform_0(%arg0: i32) -> (i32, i32, i32) {
    %c0_i32 = arith.constant 0 : i32
    %c0_i32_0 = arith.constant 0 : i32
    %c0_i32_1 = arith.constant 0 : i32
    return %arg0, %c0_i32, %c0_i32_0 : i32, i32, i32
  }
  func.func @transform_1(%arg0: i32) -> (i32, i32) {
    %c0_i32 = arith.constant 0 : i32
    %c0_i32_0 = arith.constant 0 : i32
    %c0_i32_1 = arith.constant 0 : i32
    return %c0_i32, %c0_i32_0 : i32, i32
  }
  func.func @transform_2(%arg0: i32) -> (i32, i32) {
    %c0_i32 = arith.constant 0 : i32
    %c0_i32_0 = arith.constant 0 : i32
    %c0_i32_1 = arith.constant 0 : i32
    return %c0_i32, %c0_i32_0 : i32, i32
  }
  func.func @transform_3(%arg0: i32) -> (i32, i32, i32) {
    %c0_i32 = arith.constant 0 : i32
    %c0_i32_0 = arith.constant 0 : i32
    %c0_i32_1 = arith.constant 0 : i32
    return %arg0, %c0_i32, %c0_i32_0 : i32, i32, i32
  }
}

</mosaic_0001>

<bundles_post_ra>
// kernel: gnn_forward.1
= control target key start
LH: loop header
LB: loop body
LE: loop exit
PB: predicated region body
PF: predicated region fallthrough
CT: control target
= control target key end

     0   :  { %s388_s12 = smov 0   ;;  %s436_s0 = inlined_call_operand.vmem [shape: f32[8,8,28], index: 0, kind: input, shape index: {}]   ;;  %s437_s1 = inlined_call_operand.vmem [shape: f32[28,28], index: 1, kind: input, shape index: {}]   ;;  %s438_s2 = inlined_call_operand.vmem [shape: f32[1,28], index: 2, kind: input, shape index: {}]   ;;  %s439_s3 = inlined_call_operand.vmem [shape: f32[8,8,28], index: 3, kind: output, shape index: {}]  }
   0x1 LB: > { %s334_s13 = sadd.s32 4294967295, %s365_s12   ;;  %p338_p0 = scmp.ge.s32.totalorder %s365_s12, 1  ;;  %s365_s12 = sphi %s388_s12, %s13_s12  }
   0x2   : > { %p138_p1 = scmp.lt.s32.totalorder %s365_s12, 3 }
   0x4   : > { %p139_p2 = pnand %p338_p0, %p138_p1 }
   0x5   : > { %s339_s18 = sshll.u32 (!%p139_p2), %s334_s13, 2 }
   0x6   : > { %142 = sbr.rel (%p139_p2) target bundleno = 169 (0xa9), region = 32  ;;  %p163_p3 = scmp.lt.s32.totalorder (!%p139_p2), %s339_s18, 7 }
   0xb   : > { %v221_v0 = vld [vmem:[%s437_s1 + $0x18] sm:$0xf]  ;;  %vm238_vm0 = vcmask 1043456   ;;  %v220_v1 = vld [vmem:[%s437_s1 + $0x10] sm:$0xff]  ;;  %v219_v2 = vld [vmem:[%s437_s1 + $0x8] sm:$0xff]  ;;  %v367_v3 = vmov 8.0  }
   0xc   : > { %343 = vmatpush.msk.msra.mxu0 %vm238_vm0, %v221_v0  ;;  %357 = vrcp.f32 %v367_v3  ;;  %s441_s18 = smov (!%p163_p3, %s339_s18), 7  ;;  %v218_v4 = vld [vmem:[%s437_s1] sm:$0xff]  ;;  %vm178_vm1 = vcmask 228352   ;;  %vm230_vm3 = vcmask 1041409   ;;  %vm232_vm4 = vcmask 1042434  }
   0xd   : > { %s340_s23 = sshll.u32 %s441_s18, 3  ;;  %vm234_vm5 = vcmask 1043459   ;;  %v356_v50 = vld [vmem:[%s438_s2] ss:$0 sm:$0xff] }
   0xe   : > { %255 = vmatpush.msra.mxu0 %v220_v1  ;;  %s166_s26 = scalar_lea.vmem %s436_s0, %s340_s23  ;;  %s172_s4 = scalar_lea.vmem %s439_s3, %s340_s23 }
   0xf   : > { %v174_v5 = vld [vmem:[%s166_s26] sm:$0xff]  ;;  %v175_v6 = vld [vmem:[%s166_s26 + $0x8] sm:$0xff]  ;;  %v176_v7 = vld [vmem:[%s166_s26 + $0x10] sm:$0xff] }
  0x10   : > { %256 = vmatpush.msra.mxu0 %v219_v2  ;;  %v177_v9 = vld [vmem:[%s166_s26 + $0x18] sm:$0xff]  ;;  %v179_v10 = vsel %vm178_vm1, %v174_v5, 0.0  ;;  %v186_v11 = vsel %vm178_vm1, %v175_v6, 0.0  ;;  %v193_v12 = vsel %vm178_vm1, %v176_v7, 0.0 }
  0x11   : > { %v180_v13 = vrot.slane %v179_v10, 4  ;;  %v187_v14 = vrot.slane %v186_v11, 4  ;;  %v194_v15 = vrot.slane %v193_v12, 4  ;;  %v200_v16 = vsel %vm178_vm1, %v177_v9, 0.0 }
  0x12   : > { %257 = vmatpush.msra.mxu0 %v218_v4  ;;  %v358_v8 = vpop.eup %357  ;;  %v201_v17 = vrot.slane %v200_v16, 4 }
  0x13   : > { %v208_v18 = vmul.f32 8.0, %v358_v8  ;;  %v181_v19 = vadd.f32 %v180_v13, %v179_v10  ;;  %v188_v20 = vadd.f32 %v187_v14, %v186_v11  ;;  %v195_v21 = vadd.f32 %v194_v15, %v193_v12 }
  0x14   : > { %v202_v22 = vadd.f32 %v201_v17, %v200_v16  ;;  %vm212_vm2 = vweird.f32 %v358_v8 }
  0x15   : > { %v209_v23 = vsub.f32 1.0, %v208_v18  ;;  %v182_v24 = vrot.slane %v181_v19, 2  ;;  %v189_v25 = vrot.slane %v188_v20, 2  ;;  %v196_v26 = vrot.slane %v195_v21, 2 }
  0x16   : > { %v203_v27 = vrot.slane %v202_v22, 2 }
  0x17   : > { %v210_v28 = vmul.f32 %v358_v8, %v209_v23  ;;  %v183_v29 = vadd.f32 %v182_v24, %v181_v19  ;;  %v190_v30 = vadd.f32 %v189_v25, %v188_v20  ;;  %v197_v31 = vadd.f32 %v196_v26, %v195_v21 }
  0x18   : > { %v204_v32 = vadd.f32 %v203_v27, %v202_v22 }
  0x19   : > { %v211_v33 = vadd.f32 %v358_v8, %v210_v28  ;;  %v184_v34 = vrot.slane %v183_v29, 1  ;;  %v191_v35 = vrot.slane %v190_v30, 1  ;;  %v198_v36 = vrot.slane %v197_v31, 1 }
  0x1a   : > { %v205_v37 = vrot.slane %v204_v32, 1 }
  0x1b   : > { %v213_v38 = vsel %vm212_vm2, %v358_v8, %v211_v33  ;;  %v185_v39 = vadd.f32 %v184_v34, %v183_v29  ;;  %v192_v40 = vadd.f32 %v191_v35, %v190_v30  ;;  %v199_v41 = vadd.f32 %v198_v36, %v197_v31 }
  0x1c   : > { %v206_v42 = vadd.f32 %v205_v37, %v204_v32 }
  0x1d   : > { %v214_v43 = vmul.f32 %v213_v38, %v185_v39  ;;  %v215_v44 = vmul.f32 %v213_v38, %v192_v40  ;;  %v216_v45 = vmul.f32 %v213_v38, %v199_v41 }
  0x1e   : > { %v217_v46 = vmul.f32 %v213_v38, %v206_v42 }
  0x1f   : > { %v231_v47 = vsel %vm230_vm3, %v215_v44, %v214_v43 }
  0x20   : > { %v233_v48 = vsel %vm232_vm4, %v216_v45, %v231_v47 }
  0x21   : > { %v235_v49 = vsel %vm234_vm5, %v217_v46, %v233_v48 }
  0x22   : > { %344 = vmatmul.msk.f32.vlgmr.msra.gmra.mxu0 %vm178_vm1, %v235_v49 }
  0x9f   : > { %v259_v51 = vpop.f32.mrf.mxu0 }
  0xa0   : > { %v260_v52 = vadd.f32 %v356_v50, %v259_v51 }
  0xa2   : > { %v263_v53 = vrot.slane %v260_v52, 1  ;;  %v264_v54 = vrot.slane %v260_v52, 2  ;;  %v265_v55 = vrot.slane %v260_v52, 3  ;;  %v266_v56 = vperm.slane %v260_v52, 0 }
  0xa4   : > { %v267_v57 = vperm.slane %v263_v53, 0  ;;  %v268_v58 = vperm.slane %v264_v54, 0  ;;  %274 = vst.msk [vmem:[%s172_s4] sm:$0xff] %vm178_vm1, %v266_v56  ;;  %v269_v59 = vperm.slane %v265_v55, 0 }
  0xa6   : > { %275 = vst.msk [vmem:[%s172_s4 + $0x8] sm:$0xff] %vm178_vm1, %v267_v57 }
  0xa7   : > { %276 = vst.msk [vmem:[%s172_s4 + $0x10] sm:$0xff] %vm178_vm1, %v268_v58 }
  0xa8   : > { %277 = vst.msk [vmem:[%s172_s4 + $0x18] sm:$0xff] %vm178_vm1, %v269_v59 }
  0xa9 PF: > { %s13_s12 = sadd.s32 1, %s365_s12  }
  0xaa   : > { %p10_p4 = scmp.ge.s32.totalorder %s13_s12, 4  }
  0xac   :  { %12 = sbr.rel (!%p10_p4) target bundleno = 1 (0x1), region = 62 }

</bundles_post_ra>
